<compile_context>
chip_gen: v7x
topology: tpu7x:2x2x1
jax: 0.10.0
libtpu: 0.0.40
codegen_flags: <defaults>
</compile_context>

<pallas_src>
import functools
import math

import jax
import jax.numpy as jnp
from jax.experimental import pallas as pl
from jax.experimental.pallas import tpu as pltpu

_LANES = 128
_MAX_TILE_ROWS = 4096            # 2 MiB per f32 (rows, 128) pipeline buffer.
_CHUNK_ROWS = 128                # in-kernel sub-tile (keeps temps small).
_TILE_BYTES = 2 * 1024 * 1024    # per-stream per-buffer tile target.
_CHUNK_BYTES = 128 * 1024        # per-stream in-kernel chunk target.
_MAX_ALIGNED_LANE = 2048         # lane-dim cap for the no-pad fast path.
_PRED_PAD = -200.0               # exp(-200) == 0 in f32 -> padded loss is exactly 0.
_VMEM_LIMIT_BYTES = 32 * 1024 * 1024


def _hint_multiple(x, m):
    """pl.multiple_of hint that also tolerates already-static Python ints."""
    return x if isinstance(x, int) else pl.multiple_of(x, m)


def _vfl_loss_tile(x, t, alpha, gamma, iou_weighted):
    """Elementwise varifocal loss on one (rows, lanes) chunk (f32 compute)."""
    x = x.astype(jnp.float32)
    t = t.astype(jnp.float32)

    # Shared exponential: sigmoid and the stable BCE log-term both derive from
    # e = exp(-|x|)  (one EUP exp instead of two).
    e = jnp.exp(-jnp.abs(x))
    inv = pl.reciprocal(1.0 + e)                 # exact 1/(1+e)
    sig = jnp.where(x >= 0.0, inv, e * inv)      # == sigmoid(x), stable

    d = jnp.abs(sig - t)
    g = float(gamma)
    if g == 2.0:
        mod = d * d                              # avoid pow -> exp(g*log(d))
    elif g == 1.0:
        mod = d
    elif g.is_integer() and 0.0 < g <= 4.0:
        mod = d
        for _ in range(int(g) - 1):
            mod = mod * d
    else:
        mod = jnp.power(d, jnp.float32(g))

    neg_branch = jnp.float32(alpha) * mod
    if iou_weighted:
        fw = jnp.where(t > 0.0, t, neg_branch)
    else:
        fw = jnp.where(t > 0.0, jnp.float32(1.0), neg_branch)

    # binary_cross_entropy_with_logits (stable form), reusing e = exp(-|x|).
    bce = jnp.maximum(x, 0.0) - x * t + jnp.log1p(e)
    return bce * fw


def _fold_to_8(loss):
    """Pairwise-tree fold of a (rows, lanes) f32 chunk into (8, lanes).

    rows must be a multiple of 8 (guaranteed by the wrapper)."""
    rows = loss.shape[0]
    parts = [loss[k * 8:(k + 1) * 8, :] for k in range(rows // 8)]
    while len(parts) > 1:
        nxt = [parts[i] + parts[i + 1] for i in range(0, len(parts) - 1, 2)]
        if len(parts) % 2:
            nxt.append(parts[-1])
        parts = nxt
    return parts[0]


def _vfl_elementwise_kernel(*refs, alpha, gamma, iou_weighted, loss_weight,
                            has_weight, chunk_rows, n_chunks):
    """'none' reduction: write loss_weight * loss elementwise."""
    if has_weight:
        pred_ref, tgt_ref, w_ref, out_ref = refs
    else:
        pred_ref, tgt_ref, out_ref = refs
        w_ref = None

    lw = jnp.float32(loss_weight)

    def do_chunk(lo):
        x = pred_ref[pl.ds(lo, chunk_rows), :]
        t = tgt_ref[pl.ds(lo, chunk_rows), :]
        loss = _vfl_loss_tile(x, t, alpha, gamma, iou_weighted)
        if w_ref is not None:
            loss = loss * w_ref[pl.ds(lo, chunk_rows), :].astype(jnp.float32)
        out_ref[pl.ds(lo, chunk_rows), :] = (loss * lw).astype(out_ref.dtype)

    if n_chunks == 1:
        do_chunk(0)
    else:
        @pl.loop(0, n_chunks, unroll=True)
        def _(c):
            do_chunk(_hint_multiple(c * chunk_rows, chunk_rows))


def _vfl_partial_sum_kernel(*refs, alpha, gamma, iou_weighted, has_weight,
                            chunk_rows, n_chunks):
    """'mean'/'sum' reduction: fold each block into an (8, lanes) partial sum.

    No tail mask: the wrapper guarantees either exact tiling (aligned path) or
    pred padded with -200 (padded path), so out-of-range elements contribute
    exactly zero."""
    if has_weight:
        pred_ref, tgt_ref, w_ref, out_ref = refs
    else:
        pred_ref, tgt_ref, out_ref = refs
        w_ref = None

    def chunk_partial(lo):
        x = pred_ref[pl.ds(lo, chunk_rows), :]
        t = tgt_ref[pl.ds(lo, chunk_rows), :]
        loss = _vfl_loss_tile(x, t, alpha, gamma, iou_weighted)
        if w_ref is not None:
            loss = loss * w_ref[pl.ds(lo, chunk_rows), :].astype(jnp.float32)
        return _fold_to_8(loss)

    if n_chunks == 1:
        out_ref[...] = chunk_partial(0)
    else:
        out_ref[...] = jnp.zeros_like(out_ref)

        @pl.loop(0, n_chunks, unroll=True)
        def _(c):
            out_ref[...] += chunk_partial(_hint_multiple(c * chunk_rows,
                                                         chunk_rows))


class VarifocalLoss:
    """JAX/Pallas port of VarifocalLoss.forward (use_sigmoid=True only)."""

    def __init__(self, use_sigmoid=True, alpha=0.75, gamma=2.0,
                 iou_weighted=True, reduction='mean', loss_weight=1.0):
        assert use_sigmoid is True, 'Only sigmoid varifocal loss supported now.'
        assert alpha >= 0.0
        self.alpha = float(alpha)
        self.gamma = float(gamma)
        self.iou_weighted = bool(iou_weighted)
        self.reduction = reduction
        self.loss_weight = float(loss_weight)

    # ---------------------------------------------------------------- helpers
    @staticmethod
    def _compiler_params():
        return pltpu.CompilerParams(dimension_semantics=("parallel",),
                                    vmem_limit_bytes=_VMEM_LIMIT_BYTES)

    @staticmethod
    def _cost(total, n_streams, in_itemsize, out_bytes):
        return pl.CostEstimate(
            flops=20 * total,
            transcendentals=2 * total,
            bytes_accessed=int(n_streams * total * in_itemsize + out_bytes))

    def _finish(self, total_sum, total, reduction, avg_factor):
        if avg_factor is None:
            scale = (self.loss_weight / float(total) if reduction == 'mean'
                     else self.loss_weight)
            return total_sum * jnp.float32(scale)
        if reduction != 'mean':
            raise ValueError('avg_factor can not be used with reduction="sum"')
        eps = float(jnp.finfo(jnp.float32).eps)
        # avg_factor may be a Python number or a traced JAX scalar.
        denom = jnp.asarray(avg_factor, dtype=jnp.float32) + jnp.float32(eps)
        return total_sum * (jnp.float32(self.loss_weight) / denom)

    # ------------------------------------------------------------------ call
    def __call__(self, pred, target, weight=None, avg_factor=None,
                 reduction_override=None):
        assert reduction_override in (None, 'none', 'mean', 'sum')
        reduction = reduction_override if reduction_override else self.reduction

        pred = jnp.asarray(pred)
        target = jnp.asarray(target)
        assert pred.shape == target.shape
        orig_shape = pred.shape
        total = int(math.prod(orig_shape)) if orig_shape else 1

        has_weight = weight is not None
        if has_weight:
            w = jnp.asarray(weight)
            if w.shape != orig_shape:
                # TODO(synk): stream compact per-anchor weights through their
                # own BlockSpec instead of materializing the broadcast in HBM.
                w = jnp.broadcast_to(w, orig_shape)
        else:
            w = None

        itemsize = pred.dtype.itemsize
        lane = orig_shape[-1] if len(orig_shape) >= 2 else 0
        aligned_ok = (lane >= _LANES and lane % _LANES == 0
                      and lane <= _MAX_ALIGNED_LANE)

        kernel_common = dict(alpha=self.alpha, gamma=self.gamma,
                             iou_weighted=self.iou_weighted,
                             has_weight=has_weight)

        # ------------- aligned (no-relayout / no-pad) fast path -------------
        if aligned_ok:
            lead = total // lane
            chunk = max(8, min(_CHUNK_ROWS,
                               (_CHUNK_BYTES // (lane * itemsize)) // 8 * 8))
            max_rb = max(chunk,
                         (_TILE_BYTES // (lane * itemsize)) // chunk * chunk)

            def views():
                ins = [pred.reshape(lead, lane), target.reshape(lead, lane)]
                if has_weight:
                    ins.append(w.reshape(lead, lane))
                return ins

            if reduction == 'none':
                if lead <= chunk:
                    rb, ck, nck = lead, lead, 1
                else:
                    rb = min(max_rb, (lead // chunk) * chunk)
                    ck, nck = chunk, rb // chunk
                ins = views()
                spec = pl.BlockSpec((rb, lane), lambda i: (i, 0))
                out = pl.pallas_call(
                    functools.partial(_vfl_elementwise_kernel,
                                      loss_weight=self.loss_weight,
                                      chunk_rows=ck, n_chunks=nck,
                                      **kernel_common),
                    out_shape=jax.ShapeDtypeStruct((lead, lane), pred.dtype),
                    grid_spec=pltpu.PrefetchScalarGridSpec(
                        num_scalar_prefetch=0, grid=(pl.cdiv(lead, rb),),
                        in_specs=[spec] * len(ins), out_specs=spec),
                    compiler_params=self._compiler_params(),
                    cost_estimate=self._cost(total, len(ins), itemsize,
                                             total * pred.dtype.itemsize),
                )(*ins)
                return out.reshape(orig_shape)

            # 'mean' / 'sum': only when blocks tile `lead` exactly so that no
            # garbage boundary rows can leak into the partial sums.
            rb = None
            ck = nck = 1
            if lead <= chunk:
                if lead % 8 == 0:
                    rb, ck, nck = lead, lead, 1
            elif lead % chunk == 0:
                rb = chunk
                for cand in range(chunk, max_rb + 1, chunk):
                    if lead % cand == 0:
                        rb = cand
                ck, nck = chunk, rb // chunk
            if rb is not None:
                ins = views()
                n_tiles = lead // rb
                partials = pl.pallas_call(
                    functools.partial(_vfl_partial_sum_kernel,
                                      chunk_rows=ck, n_chunks=nck,
                                      **kernel_common),
                    out_shape=jax.ShapeDtypeStruct((n_tiles * 8, lane),
                                                   jnp.float32),
                    grid_spec=pltpu.PrefetchScalarGridSpec(
                        num_scalar_prefetch=0, grid=(n_tiles,),
                        in_specs=[pl.BlockSpec((rb, lane),
                                               lambda i: (i, 0))] * len(ins),
                        out_specs=pl.BlockSpec((8, lane), lambda i: (i, 0))),
                    compiler_params=self._compiler_params(),
                    cost_estimate=self._cost(total, len(ins), itemsize,
                                             n_tiles * 8 * lane * 4),
                )(*ins)
                return self._finish(jnp.sum(partials, dtype=jnp.float32),
                                    total, reduction, avg_factor)
            # else: fall through to the padded fallback.

        # ------------- padded lane-dense (rows, 128) fallback ---------------
        rows = pl.cdiv(total, _LANES)
        if rows <= _CHUNK_ROWS:
            tile_rows = ((rows + 7) // 8) * 8
            chunk, n_chunks = tile_rows, 1
        else:
            tile_rows = min(_MAX_TILE_ROWS,
                            ((rows + _CHUNK_ROWS - 1) // _CHUNK_ROWS)
                            * _CHUNK_ROWS)
            chunk, n_chunks = _CHUNK_ROWS, tile_rows // _CHUNK_ROWS
        n_tiles = pl.cdiv(rows, tile_rows)
        rows_padded = n_tiles * tile_rows
        padded_total = rows_padded * _LANES

        def flatten_pad(a, pad_value):
            flat = a.reshape(-1)
            if padded_total > total:
                flat = jnp.pad(flat, (0, padded_total - total),
                               constant_values=pad_value)
            return flat.reshape(rows_padded, _LANES)

        # pred padded with -200 -> sigmoid==0, focal weight==0, bce==0: padded
        # elements contribute *exactly* 0, so no in-kernel tail mask is needed.
        ins = [flatten_pad(pred, _PRED_PAD), flatten_pad(target, 0.0)]
        if has_weight:
            ins.append(flatten_pad(w, 0.0))
        in_spec = pl.BlockSpec((tile_rows, _LANES), lambda i: (i, 0))

        if reduction == 'none':
            # Size the output to the unpadded row count when the grid has more
            # than one step (Pallas masks the boundary block's store).
            out_rows = rows_padded if n_tiles == 1 else rows
            out = pl.pallas_call(
                functools.partial(_vfl_elementwise_kernel,
                                  loss_weight=self.loss_weight,
                                  chunk_rows=chunk, n_chunks=n_chunks,
                                  **kernel_common),
                out_shape=jax.ShapeDtypeStruct((out_rows, _LANES), pred.dtype),
                grid_spec=pltpu.PrefetchScalarGridSpec(
                    num_scalar_prefetch=0, grid=(n_tiles,),
                    in_specs=[in_spec] * len(ins), out_specs=in_spec),
                compiler_params=self._compiler_params(),
                cost_estimate=self._cost(total, len(ins), itemsize,
                                         total * pred.dtype.itemsize),
            )(*ins)
            flat = out.reshape(-1)
            if out_rows * _LANES != total:
                flat = flat[:total]
            return flat.reshape(orig_shape)

        partials = pl.pallas_call(
            functools.partial(_vfl_partial_sum_kernel,
                              chunk_rows=chunk, n_chunks=n_chunks,
                              **kernel_common),
            out_shape=jax.ShapeDtypeStruct((n_tiles * 8, _LANES), jnp.float32),
            grid_spec=pltpu.PrefetchScalarGridSpec(
                num_scalar_prefetch=0, grid=(n_tiles,),
                in_specs=[in_spec] * len(ins),
                out_specs=pl.BlockSpec((8, _LANES), lambda i: (i, 0))),
            compiler_params=self._compiler_params(),
            cost_estimate=self._cost(total, len(ins), itemsize,
                                     n_tiles * 8 * _LANES * 4),
        )(*ins)
        return self._finish(jnp.sum(partials, dtype=jnp.float32),
                            total, reduction, avg_factor)


# --------------------------------------------------------------------- tests
def _reference(pred, target, weight, alpha, gamma, iou_weighted, loss_weight,
               reduction, avg_factor=None):
    pred = pred.astype(jnp.float32)
    target = target.astype(jnp.float32)
    sig = jax.nn.sigmoid(pred)
    pos = (target > 0.0).astype(jnp.float32)
    neg = (target <= 0.0).astype(jnp.float32)
    mod = jnp.abs(sig - target) ** gamma
    if iou_weighted:
        fw = target * pos + alpha * mod * neg
    else:
        fw = pos + alpha * mod * neg
    bce = (jnp.maximum(pred, 0.0) - pred * target
           + jnp.log1p(jnp.exp(-jnp.abs(pred))))
    loss = bce * fw
    if weight is not None:
        loss = loss * jnp.broadcast_to(jnp.asarray(weight, jnp.float32),
                                       loss.shape)
    if avg_factor is None:
        if reduction == 'mean':
            loss = loss.mean()
        elif reduction == 'sum':
            loss = loss.sum()
    elif reduction == 'mean':
        loss = loss.sum() / (avg_factor + float(jnp.finfo(jnp.float32).eps))
    return loss_weight * loss


if __name__ == "__main__":
    key = jax.random.PRNGKey(0)
    k1, k2, k3, k4, k5, k6, k7 = jax.random.split(key, 7)

    module = VarifocalLoss(use_sigmoid=True, alpha=0.75, gamma=2.0,
                           iou_weighted=True, reduction='mean',
                           loss_weight=1.0)

    # --- case 1: (N, C) with C not lane aligned -> padded fallback path ---
    N, C = 50, 20
    pred = jax.random.normal(k1, (N, C), dtype=jnp.float32) * 2.0
    iou = jax.random.uniform(k2, (N, C), dtype=jnp.float32)
    mask = (jax.random.uniform(k3, (N, C)) < 0.15).astype(jnp.float32)
    target = iou * mask
    weight = jax.random.uniform(k4, (N, C), dtype=jnp.float32)

    loss_mean = module(pred, target)
    jax.block_until_ready(loss_mean)
    ref_mean = _reference(pred, target, None, 0.75, 2.0, True, 1.0, 'mean')
    assert jnp.allclose(loss_mean, ref_mean, rtol=2e-5, atol=1e-6), (
        loss_mean, ref_mean)

    loss_sum = module(pred, target, reduction_override='sum')
    jax.block_until_ready(loss_sum)
    ref_sum = _reference(pred, target, None, 0.75, 2.0, True, 1.0, 'sum')
    assert jnp.allclose(loss_sum, ref_sum, rtol=2e-5, atol=1e-5), (
        loss_sum, ref_sum)

    loss_none = module(pred, target, reduction_override='none')
    jax.block_until_ready(loss_none)
    ref_none = _reference(pred, target, None, 0.75, 2.0, True, 1.0, 'none')
    assert loss_none.shape == (N, C)
    assert jnp.allclose(loss_none, ref_none, rtol=2e-5, atol=1e-6), (
        "elementwise mismatch")

    loss_w = module(pred, target, weight=weight, avg_factor=37.0)
    jax.block_until_ready(loss_w)
    ref_w = _reference(pred, target, weight, 0.75, 2.0, True, 1.0, 'mean',
                       avg_factor=37.0)
    assert jnp.allclose(loss_w, ref_w, rtol=2e-5, atol=1e-6), (loss_w, ref_w)

    # avg_factor as a (traced-compatible) JAX scalar.
    loss_w2 = module(pred, target, weight=weight,
                     avg_factor=jnp.float32(37.0))
    jax.block_until_ready(loss_w2)
    assert jnp.allclose(loss_w2, ref_w, rtol=2e-5, atol=1e-6), (loss_w2, ref_w)

    # --- case 2: lane-aligned last dim -> no-pad fast path (both kernels) ---
    B, Nq, Ca = 2, 64, 128
    pred2 = jax.random.normal(k5, (B, Nq, Ca), dtype=jnp.float32) * 2.0
    iou2 = jax.random.uniform(k6, (B, Nq, Ca), dtype=jnp.float32)
    mask2 = (jax.random.uniform(k7, (B, Nq, Ca)) < 0.15).astype(jnp.float32)
    target2 = iou2 * mask2

    l2_none = module(pred2, target2, reduction_override='none')
    jax.block_until_ready(l2_none)
    r2_none = _reference(pred2, target2, None, 0.75, 2.0, True, 1.0, 'none')
    assert l2_none.shape == (B, Nq, Ca)
    assert jnp.allclose(l2_none, r2_none, rtol=2e-5, atol=1e-6), (
        "aligned elementwise mismatch")

    l2_mean = module(pred2, target2)
    jax.block_until_ready(l2_mean)
    r2_mean = _reference(pred2, target2, None, 0.75, 2.0, True, 1.0, 'mean')
    assert jnp.allclose(l2_mean, r2_mean, rtol=2e-5, atol=1e-6), (
        l2_mean, r2_mean)

    print("KERNEL_OK")
</pallas_src>

<mosaic_0001>
module attributes {stable_mosaic.version = 11 : i64} {
  func.func @_vfl_partial_sum_kernel(%arg0: i32, %arg1: memref<8x128xf32, #tpu.memory_space<vmem>>, %arg2: memref<8x128xf32, #tpu.memory_space<vmem>>, %arg3: memref<8x128xf32, #tpu.memory_space<vmem>>) attributes {dimension_semantics = [#tpu.dimension_semantics<parallel>], iteration_bounds = array<i64: 1>, scalar_prefetch = 0 : i64, scratch_operands = 0 : i64, tpu.core_type = #tpu.core_type<tc>, window_params = [{transform_indices = @transform_0, window_bounds = array<i64: 8, 128>}, {transform_indices = @transform_1, window_bounds = array<i64: 8, 128>}, {transform_indices = @transform_2, window_bounds = array<i64: 8, 128>}]} {
    %c0 = arith.constant 0 : index
    %c0_0 = arith.constant 0 : index
    %0 = vector.load %arg1[%c0, %c0_0] : memref<8x128xf32, #tpu.memory_space<vmem>>, vector<8x128xf32>
    %c0_1 = arith.constant 0 : index
    %c0_2 = arith.constant 0 : index
    %1 = vector.load %arg2[%c0_1, %c0_2] : memref<8x128xf32, #tpu.memory_space<vmem>>, vector<8x128xf32>
    %2 = math.absf %0 : vector<8x128xf32>
    %cst = arith.constant 0.000000e+00 : f32
    %3 = vector.broadcast %cst : f32 to vector<8x128xf32>
    %4 = arith.subf %3, %2 : vector<8x128xf32>
    %5 = math.exp %4 : vector<8x128xf32>
    %cst_3 = arith.constant 1.000000e+00 : f32
    %6 = vector.broadcast %cst_3 : f32 to vector<8x128xf32>
    %7 = arith.addf %6, %5 : vector<8x128xf32>
    %8 = tpu.reciprocal %7 : vector<8x128xf32> -> vector<8x128xf32>
    %cst_4 = arith.constant 0.000000e+00 : f32
    %9 = vector.broadcast %cst_4 : f32 to vector<8x128xf32>
    %10 = arith.cmpf oge, %0, %9 : vector<8x128xf32>
    %11 = arith.mulf %5, %8 : vector<8x128xf32>
    %12 = arith.select %10, %8, %11 : vector<8x128xi1>, vector<8x128xf32>
    %13 = arith.subf %12, %1 : vector<8x128xf32>
    %14 = math.absf %13 : vector<8x128xf32>
    %15 = arith.mulf %14, %14 : vector<8x128xf32>
    %cst_5 = arith.constant 7.500000e-01 : f32
    %16 = vector.broadcast %cst_5 : f32 to vector<8x128xf32>
    %17 = arith.mulf %16, %15 : vector<8x128xf32>
    %cst_6 = arith.constant 0.000000e+00 : f32
    %18 = vector.broadcast %cst_6 : f32 to vector<8x128xf32>
    %19 = arith.cmpf ogt, %1, %18 : vector<8x128xf32>
    %20 = arith.select %19, %1, %17 : vector<8x128xi1>, vector<8x128xf32>
    %cst_7 = arith.constant 0.000000e+00 : f32
    %21 = vector.broadcast %cst_7 : f32 to vector<8x128xf32>
    %22 = arith.maximumf %0, %21 : vector<8x128xf32>
    %23 = arith.mulf %0, %1 : vector<8x128xf32>
    %24 = arith.subf %22, %23 : vector<8x128xf32>
    %25 = math.log1p %5 : vector<8x128xf32>
    %26 = arith.addf %24, %25 : vector<8x128xf32>
    %27 = arith.mulf %26, %20 : vector<8x128xf32>
    %c0_8 = arith.constant 0 : index
    %c0_9 = arith.constant 0 : index
    %28 = vector.load %arg3[%c0_8, %c0_9] : memref<8x128xf32, #tpu.memory_space<vmem>>, vector<8x128xf32>
    tpu.vector_store %arg3[%c0_8, %c0_9], %27 {strides = array<i32>} : memref<8x128xf32, #tpu.memory_space<vmem>>, vector<8x128xf32>,
    return
  }
  func.func @transform_0(%arg0: i32) -> (i32, i32) {
    %c0_i32 = arith.constant 0 : i32
    %c0_i32_0 = arith.constant 0 : i32
    return %arg0, %c0_i32 : i32, i32
  }
  func.func @transform_1(%arg0: i32) -> (i32, i32) {
    %c0_i32 = arith.constant 0 : i32
    %c0_i32_0 = arith.constant 0 : i32
    return %arg0, %c0_i32 : i32, i32
  }
  func.func @transform_2(%arg0: i32) -> (i32, i32) {
    %c0_i32 = arith.constant 0 : i32
    %c0_i32_0 = arith.constant 0 : i32
    return %arg0, %c0_i32 : i32, i32
  }
}

</mosaic_0001>

<bundles_post_ra>
// kernel: tpu_custom_call.1
= control target key start
LH: loop header
LB: loop body
LE: loop exit
PB: predicated region body
PF: predicated region fallthrough
CT: control target
= control target key end

     0   :  { %7 = vsyncpa [#allocation3], 0  ;;  %s219_s0 = inlined_call_operand.hbm [shape: f32[8,128], index: 0, kind: input, shape index: {}]   ;;  %s220_s1 = inlined_call_operand.hbm [shape: f32[8,128], index: 1, kind: input, shape index: {}]   ;;  %s221_s2 = inlined_call_operand.hbm [shape: f32[8,128], index: 2, kind: output, shape index: {}]  }
   0x1   :  { %8 = vsyncpa [#allocation6], 0 }
   0x2   :  { %9 = vsyncpa [#allocation4], 0  ;;  %s165_s9 = smov [#allocation2]   ;;  %s166_s11 = smov [#allocation5]  }
   0x3   :  { %s16_s10 = sshll.u32 %s165_s9, 4  ;;  %s26_s12 = sshll.u32 %s166_s11, 4  ;;  %s17_s10 = int_to_ptr.vmem [resolvable:$true] %s16_s10  ;;  %s27_s12 = int_to_ptr.vmem [resolvable:$true] %s26_s12 }
   0x4   :  { %s93_s15 = scalar_lea.hbm %s219_s0, 128 }
   0x5   :  { %p94_p0 = scmp.ne.s32.totalorder %s219_s0, %s93_s15  ;;  %p97_p1 = scmp.lt.u32.totalorder %s93_s15, %s219_s0 }
   0x7   :  { %p99_p2 = pnand %p97_p1, %p94_p0 }
   0x9   :  { %102 = shalt.err (!%p99_p2)
}
   0xa   :  { %s103_s20 = scalar_lea.vmem %s17_s10, 128  ;;  %p108_p4 = scmp.lt.s32.totalorder %s17_s10, %s17_s10 }
   0xb   :  { %p104_p3 = scmp.ne.s32.totalorder %s17_s10, %s103_s20  ;;  %p109_p5 = scmp.lt.s32.totalorder %s103_s20, %s103_s20 }
   0xd   :  { %p110_p6 = por %p109_p5, %p108_p4 }
   0xf   :  { %p111_p7 = pnand %p110_p6, %p104_p3 }
  0x11   :  { %114 = shalt.err (!%p111_p7)
}
  0x12   :  { %19 = dma.hbm_to_vmem [thread:$0]  %s219_s0, 128, %s17_s10, [#allocation3]  }
  0x13   :  { %s115_s25 = scalar_lea.hbm %s220_s1, 128 }
  0x14   :  { %p116_p8 = scmp.ne.s32.totalorder %s220_s1, %s115_s25  ;;  %p119_p9 = scmp.lt.u32.totalorder %s115_s25, %s220_s1 }
  0x16   :  { %p121_p10 = pnand %p119_p9, %p116_p8 }
  0x18   :  { %124 = shalt.err (!%p121_p10)
}
  0x19   :  { %s125_s30 = scalar_lea.vmem %s27_s12, 128  ;;  %p130_p12 = scmp.lt.s32.totalorder %s27_s12, %s27_s12 }
  0x1a   :  { %p126_p11 = scmp.ne.s32.totalorder %s27_s12, %s125_s30  ;;  %p131_p13 = scmp.lt.s32.totalorder %s125_s30, %s125_s30 }
  0x1c   :  { %p132_p0 = por %p131_p13, %p130_p12 }
  0x1e   :  { %p133_p1 = pnand %p132_p0, %p126_p11 }
  0x20   :  { %136 = shalt.err (!%p133_p1)
}
  0x21   :  { %29 = dma.hbm_to_vmem [thread:$0]  %s220_s1, 128, %s27_s12, [#allocation6]  }
  0x22   :  { %159 = dma.done.wait [#allocation3], 128  }
  0x23   :  { %160 = vsyncadd [#allocation3], 4294967168 }
  0x24   :  { %161 = dma.done.wait [#allocation6], 128  }
  0x25   :  { %162 = vsyncadd [#allocation6], 4294967168  ;;  %v36_v0 = vld [vmem:[#allocation2] sm:$0xff]  ;;  %v37_v10 = vld [vmem:[#allocation5] sm:$0xff]  ;;  %s167_s1 = smov [#allocation7]  }
  0x26   :  { %v38_v1 = vand.u32 2147483647, %v36_v0  ;;  %vm44_vm0 = vcmp.ge.f32.partialorder %v36_v0, 0.0  ;;  %v53_v13 = vmax.f32 %v36_v0, 0.0  ;;  %v54_v14 = vmul.f32 %v37_v10, %v36_v0  ;;  %s74_s4 = sshll.u32 %s167_s1, 4  ;;  %s75_s4 = int_to_ptr.vmem [resolvable:$true] %s74_s4 }
  0x27   :  { %vm51_vm2 = vcmp.gt.f32.partialorder %v37_v10, 0.0  ;;  %s137_s5 = scalar_lea.vmem %s75_s4, 128  ;;  %p142_p3 = scmp.lt.s32.totalorder %s75_s4, %s75_s4 }
  0x28   :  { %v39_v2 = vsub.f32 0.0, %v38_v1  ;;  %v55_v19 = vsub.f32 %v53_v13, %v54_v14  ;;  %p138_p2 = scmp.ne.s32.totalorder %s75_s4, %s137_s5  ;;  %p143_p4 = scmp.lt.s32.totalorder %s137_s5, %s137_s5 }
  0x2a   :  { %v40_v3 = vmul.f32 1.442695, %v39_v2  ;;  %p144_p5 = por %p143_p4, %p142_p3 }
  0x2c   :  { %87 = vpow2.f32 %v40_v3  ;;  %p145_p6 = pnand %p144_p5, %p138_p2 }
  0x36   :  { %v88_v4 = vpop.eup %87 }
  0x37   :  { %v42_v5 = vadd.f32 1.0, %v88_v4  ;;  %v59_v6 = vmul.f32 -0.5, %v88_v4  ;;  %v62_v8 = vand.u32 2147483647, %v88_v4 }
  0x39   :  { %89 = vrcp.f32 %v42_v5  ;;  %v60_v7 = vadd.f32 1.0, %v59_v6  ;;  %vm63_vm1 = vcmp.lt.f32.partialorder %v62_v8, 0.0004427343 }
  0x3a   :  { %91 = vlog2.f32 %v42_v5 }
  0x3b   :  { %v61_v16 = vmul.f32 %v88_v4, %v60_v7 }
  0x43   :  { %v90_v9 = vpop.eup %89 }
  0x44   :  { %v92_v11 = vpop.eup %91  ;;  %v45_v12 = vmul.f32 %v90_v9, %v88_v4 }
  0x45   :  { %v58_v15 = vmul.f32 0.6931472, %v92_v11 }
  0x46   :  { %v46_v17 = vsel %vm44_vm0, %v90_v9, %v45_v12 }
  0x47   :  { %v47_v18 = vsub.f32 %v46_v17, %v37_v10  ;;  %v64_v21 = vsel %vm63_vm1, %v61_v16, %v58_v15 }
  0x48   :  { %v65_v23 = vadd.f32 %v64_v21, %v55_v19 }
  0x49   :  { %v48_v20 = vand.u32 2147483647, %v47_v18 }
  0x4b   :  { %v49_v22 = vmul.f32 %v48_v20, %v48_v20 }
  0x4d   :  { %v50_v24 = vmul.f32 0.75, %v49_v22 }
  0x4f   :  { %v52_v25 = vsel %vm51_vm2, %v37_v10, %v50_v24 }
  0x50   :  { %v66_v26 = vmul.f32 %v65_v23, %v52_v25 }
  0x52   :  { %67 = vst [vmem:[#allocation7] sm:$0xff] %v66_v26 }
  0x53   :  { %148 = shalt.err (!%p145_p6)
}
  0x54   :  { %s149_s8 = scalar_lea.hbm %s221_s2, 128 }
  0x55   :  { %p150_p7 = scmp.ne.s32.totalorder %s221_s2, %s149_s8  ;;  %p153_p8 = scmp.lt.u32.totalorder %s149_s8, %s221_s2 }
  0x57   :  { %p155_p9 = pnand %p153_p8, %p150_p7 }
  0x59   :  { %158 = shalt.err (!%p155_p9)
}
  0x5a   :  { %77 = dma.vmem_to_hbm [thread:$0]  %s75_s4, 128, %s221_s2, [#allocation4]  }
  0x5b   :  { %163 = dma.done.wait [#allocation4], 128  }
  0x5c   :  { %164 = vsyncadd [#allocation4], 4294967168 }
  0x5d   :  { %81 = vsyncpa [#allocation3], 1 }
  0x5e   :  { %82 = vsyncpa [#allocation6], 1 }
  0x5f   :  { %83 = vsyncpa [#allocation4], 1 }

</bundles_post_ra>
